<compile_context>
chip_gen: v6e
topology: v6e:2x2x1
jax: 0.10.0
libtpu: 0.0.40
codegen_flags: <defaults>
</compile_context>

<pallas_src>
import functools

import jax
import jax.numpy as jnp
from jax.experimental import pallas as pl
from jax.experimental.pallas import tpu as pltpu


def _pick_tile(n, candidates, min_blocks=1):
    """Largest tile from `candidates` dividing n and leaving >= min_blocks blocks."""
    for t in candidates:
        if t <= n and n % t == 0 and n // t >= min_blocks:
            return t
    for t in range(min(n, 1024), 0, -128):      # fallback: any multiple-of-128 divisor
        if n % t == 0:
            return t
    return n


def _sage_layer_kernel(adj_ref, x_src_ref, x_dst_ref, inv_deg_ref, wl_ref, wr_ref,
                       out_ref, acc_ref, *, apply_relu, x_resident, tk):
    k = pl.program_id(1)

    @pl.when(k == 0)
    def _init():
        acc_ref[...] = jnp.zeros_like(acc_ref)

    # Single cast int8 -> bf16 (one VPU pass; the 0/1 mask is exact in bf16).
    adj_bf = adj_ref[...].astype(jnp.bfloat16)                       # (TM, TK)
    if x_resident:
        start = pl.multiple_of(k * tk, tk)
        x_src = x_src_ref[pl.ds(start, tk), :]                       # (TK, F_in) bf16
    else:
        x_src = x_src_ref[...]
    # Neighbor-feature sum on the MXU, f32 accumulation in VMEM scratch.
    acc_ref[...] += jnp.dot(adj_bf, x_src, preferred_element_type=jnp.float32)

    @pl.when(k == pl.num_programs(1) - 1)
    def _finalize():
        # Mean aggregation with the precomputed 1/degree.  Rows with no incoming
        # edges have sum == 0 so they stay exactly 0 (matches spmm reduce='mean').
        agg = (acc_ref[...] * inv_deg_ref[...]).astype(jnp.bfloat16)  # (TM, F_in)
        h = jnp.dot(agg, wl_ref[...], preferred_element_type=jnp.float32)
        h += jnp.dot(x_dst_ref[...], wr_ref[...], preferred_element_type=jnp.float32)
        if apply_relu:
            h = jnp.maximum(h, 0.0)
        out_ref[...] = h.astype(out_ref.dtype)


def sage_conv_layer(x_bf, adj_i8, inv_deg, wl, wr, *, apply_relu, out_dtype):
    """One SAGEConv layer (mean aggr, root_weight=True, bias=False), fused ReLU.

    x_bf    : (N_pad, F_in) bf16, N_pad a multiple of 128
    adj_i8  : (N_pad, N_pad) int8 adjacency mask (row = target, col = source)
    inv_deg : (N_pad, 1) f32 precomputed 1 / max(row_degree, 1)
    wl, wr  : (F_in, F_out) f32 weights
    returns : (N_pad, F_out) array of dtype `out_dtype`
    """
    n_pad, f_in = x_bf.shape
    f_out = wl.shape[1]

    # Lane-dense output: pad output width to a multiple of 128 with zero weight
    # columns, store an unmasked tile, slice padding off outside the kernel.
    f_out_pad = ((f_out + 127) // 128) * 128
    wl_b = wl.astype(jnp.bfloat16)
    wr_b = wr.astype(jnp.bfloat16)
    if f_out_pad != f_out:
        wl_b = jnp.pad(wl_b, ((0, 0), (0, f_out_pad - f_out)))
        wr_b = jnp.pad(wr_b, ((0, 0), (0, f_out_pad - f_out)))

    # Large tiles: TM keeps >= 2 row blocks when possible (v7x megacore), TK up to
    # 1024 on the reduction axis so the int8 adj DMA per step is big.
    tm = _pick_tile(n_pad, (512, 384, 256, 128), min_blocks=2)
    tk = _pick_tile(n_pad, (1024, 896, 768, 640, 512, 384, 256, 128), min_blocks=1)
    grid = (n_pad // tm, n_pad // tk)

    # Keep the whole x resident in VMEM when it fits a conservative budget
    # (x is then read from HBM exactly once per layer); otherwise stream blocks.
    x_bytes = n_pad * f_in * 2
    x_resident = x_bytes <= 8 * 1024 * 1024

    out_itemsize = jnp.dtype(out_dtype).itemsize

    kernel = functools.partial(_sage_layer_kernel, apply_relu=apply_relu,
                               x_resident=x_resident, tk=tk)

    in_specs = [
        pl.BlockSpec((tm, tk), lambda i, k: (i, k)),                  # adj tile (int8)
        (pl.BlockSpec((n_pad, f_in), lambda i, k: (0, 0)) if x_resident
         else pl.BlockSpec((tk, f_in), lambda i, k: (k, 0))),         # x (source)
        pl.BlockSpec((tm, f_in), lambda i, k: (i, 0)),                # x (root)
        pl.BlockSpec((tm, 1), lambda i, k: (i, 0)),                   # 1/degree
        pl.BlockSpec((f_in, f_out_pad), lambda i, k: (0, 0)),         # W_l
        pl.BlockSpec((f_in, f_out_pad), lambda i, k: (0, 0)),         # W_r
    ]

    # Explicit VMEM budget (double-buffered blocks + scratch), capped for v7x (64 MiB).
    vmem_need = (2 * tm * tk * 1
                 + 2 * (n_pad if x_resident else tk) * f_in * 2
                 + 2 * tm * f_in * 2
                 + 2 * tm * 128 * 4                       # (tm,1) block, lane-padded
                 + 2 * 2 * f_in * f_out_pad * 2
                 + 2 * tm * f_out_pad * out_itemsize
                 + tm * f_in * 4)
    vmem_limit = int(min(64 * 1024 * 1024, max(32 * 1024 * 1024, 2 * vmem_need)))

    x_src_hbm_bytes = (n_pad * f_in * 2 if x_resident
                       else (n_pad // tm) * n_pad * f_in * 2)
    flops = 2 * n_pad * n_pad * f_in + 4 * n_pad * f_in * f_out_pad
    bytes_accessed = (adj_i8.size                          # int8 adjacency stream
                      + x_src_hbm_bytes                    # x as source (once if resident)
                      + n_pad * f_in * 2                   # x as root
                      + n_pad * 4                          # 1/degree
                      + 2 * f_in * f_out_pad * 2           # weights
                      + n_pad * f_out_pad * out_itemsize)  # output writeback

    out = pl.pallas_call(
        kernel,
        out_shape=jax.ShapeDtypeStruct((n_pad, f_out_pad), out_dtype),
        grid_spec=pltpu.PrefetchScalarGridSpec(
            num_scalar_prefetch=0,
            grid=grid,
            in_specs=in_specs,
            out_specs=pl.BlockSpec((tm, f_out_pad), lambda i, k: (i, 0)),
            scratch_shapes=[
                pltpu.VMEM((tm, f_in), jnp.float32),       # neighbor-sum accumulator
            ],
        ),
        compiler_params=pltpu.CompilerParams(
            dimension_semantics=("parallel", "arbitrary"),
            vmem_limit_bytes=vmem_limit,
        ),
        cost_estimate=pl.CostEstimate(
            flops=int(flops), transcendentals=0,
            bytes_accessed=int(bytes_accessed)),
    )(adj_i8, x_bf, x_bf, inv_deg, wl_b, wr_b)

    if f_out_pad != f_out:
        out = out[:, :f_out]
    return out


def sage_forward(x, adj, params):
    """SAGE.forward (eval / val_test mode): [conv -> relu]* -> conv."""
    n = x.shape[0]
    n_pad = ((n + 127) // 128) * 128

    adj_i8 = (adj > 0).astype(jnp.int8)
    h = x.astype(jnp.bfloat16)                 # activations carried in bf16
    if n_pad != n:
        # Zero-pad: padded sources contribute nothing (adj columns are zero),
        # padded target rows are sliced off at the end.
        adj_i8 = jnp.pad(adj_i8, ((0, n_pad - n), (0, n_pad - n)))
        h = jnp.pad(h, ((0, n_pad - n), (0, 0)))

    # Precompute 1/degree once per graph (depends only on adj, shared by all layers).
    deg = jnp.sum(adj_i8.astype(jnp.float32), axis=1, keepdims=True)
    inv_deg = 1.0 / jnp.maximum(deg, 1.0)

    n_layers = len(params)
    for li, p in enumerate(params):
        is_last = li == n_layers - 1
        h = sage_conv_layer(h, adj_i8, inv_deg, p["wl"], p["wr"],
                            apply_relu=not is_last,
                            out_dtype=jnp.float32 if is_last else jnp.bfloat16)
        # F.dropout(..., training=False) == identity

    return h[:n]


def sage_forward_ref(x, adj, params):
    """Pure-JAX f32 reference of the same forward pass."""
    h = x.astype(jnp.float32)
    mask = (adj > 0).astype(jnp.float32)
    deg = jnp.maximum(jnp.sum(mask, axis=1, keepdims=True), 1.0)
    n_layers = len(params)
    for li, p in enumerate(params):
        agg = (mask @ h) / deg
        h_new = agg @ p["wl"] + h @ p["wr"]
        if li != n_layers - 1:
            h_new = jnp.maximum(h_new, 0.0)
        h = h_new
    return h


def glorot(key, shape):
    fan_in, fan_out = shape[-2], shape[-1]
    scale = jnp.sqrt(6.0 / (fan_in + fan_out))
    return jax.random.uniform(key, shape, jnp.float32, -scale, scale)


if __name__ == "__main__":
    # SAGE(in_channels, hidden_channels, out_channels, num_layers=2):
    #   SAGEConv(F_in, hidden, bias=False) -> relu -> SAGEConv(hidden, F_out, bias=False)
    N, F_in, hidden, F_out = 256, 64, 128, 32

    key = jax.random.PRNGKey(0)
    kx, kadj, k0, k1, k2, k3 = jax.random.split(key, 6)

    x = jax.random.normal(kx, (N, F_in), jnp.float32)

    # Deterministic sparse adjacency (row = target, col = source) + self loops so
    # every target has at least one incoming edge.
    adj = (jax.random.uniform(kadj, (N, N)) < 0.05).astype(jnp.float32)
    adj = jnp.maximum(adj, jnp.eye(N, dtype=jnp.float32))

    params = [
        dict(wl=glorot(k0, (F_in, hidden)), wr=glorot(k1, (F_in, hidden))),
        dict(wl=glorot(k2, (hidden, F_out)), wr=glorot(k3, (hidden, F_out))),
    ]

    out = sage_forward(x, adj, params)
    out = jax.block_until_ready(out)

    assert out.shape == (N, F_out), out.shape
    assert jnp.all(jnp.isfinite(out))

    # Loose tolerance: matmuls use bf16 operands (f32 accumulation) and inter-layer
    # activations are stored in bf16.
    ref = sage_forward_ref(x, adj, params)
    scale = jnp.max(jnp.abs(ref)) + 1.0
    max_err = jnp.max(jnp.abs(out - ref))
    assert max_err <= 0.05 * scale, (max_err, scale)

    print("KERNEL_OK")
</pallas_src>

<mosaic_0001>
module attributes {stable_mosaic.version = 11 : i64} {
  func.func @_sage_layer_kernel(%arg0: i32, %arg1: i32, %arg2: memref<128x256xi8, #tpu.memory_space<vmem>>, %arg3: memref<256x64xbf16, #tpu.memory_space<vmem>>, %arg4: memref<128x64xbf16, #tpu.memory_space<vmem>>, %arg5: memref<128x1xf32, #tpu.memory_space<vmem>>, %arg6: memref<64x128xbf16, #tpu.memory_space<vmem>>, %arg7: memref<64x128xbf16, #tpu.memory_space<vmem>>, %arg8: memref<128x128xbf16, #tpu.memory_space<vmem>>, %arg9: memref<128x64xf32, #tpu.memory_space<vmem>>) attributes {dimension_semantics = [#tpu.dimension_semantics<parallel>, #tpu.dimension_semantics<arbitrary>], iteration_bounds = array<i64: 2, 1>, scalar_prefetch = 0 : i64, scratch_operands = 1 : i64, tpu.core_type = #tpu.core_type<tc>, window_params = [{transform_indices = @transform_0, window_bounds = array<i64: 128, 256>}, {pipeline_mode = #tpu.pipeline_mode<synchronous>, transform_indices = @transform_1, window_bounds = array<i64: 256, 64>}, {transform_indices = @transform_2, window_bounds = array<i64: 128, 64>}, {transform_indices = @transform_3, window_bounds = array<i64: 128, 1>}, {pipeline_mode = #tpu.pipeline_mode<synchronous>, transform_indices = @transform_4, window_bounds = array<i64: 64, 128>}, {pipeline_mode = #tpu.pipeline_mode<synchronous>, transform_indices = @transform_5, window_bounds = array<i64: 64, 128>}, {transform_indices = @transform_6, window_bounds = array<i64: 128, 128>}]} {
    %c0_i32 = arith.constant 0 : i32
    %0 = arith.cmpi eq, %arg1, %c0_i32 : i32
    %1 = arith.extui %0 : i1 to i32
    %c0_i32_0 = arith.constant 0 : i32
    %2 = arith.cmpi ne, %1, %c0_i32_0 : i32
    scf.if %2 {
      %cst_9 = arith.constant 0.000000e+00 : f32
      %16 = vector.broadcast %cst_9 : f32 to vector<128x64xf32>
      %c0_10 = arith.constant 0 : index
      %c0_11 = arith.constant 0 : index
      %17 = vector.load %arg9[%c0_10, %c0_11] : memref<128x64xf32, #tpu.memory_space<vmem>>, vector<128x64xf32>
      tpu.vector_store %arg9[%c0_10, %c0_11], %16 {strides = array<i32>} : memref<128x64xf32, #tpu.memory_space<vmem>>, vector<128x64xf32>,
    } else {
    }
    %c0 = arith.constant 0 : index
    %c0_1 = arith.constant 0 : index
    %3 = vector.load %arg2[%c0, %c0_1] : memref<128x256xi8, #tpu.memory_space<vmem>>, vector<128x256xi8>
    %4 = arith.sitofp %3 : vector<128x256xi8> to vector<128x256xbf16>
    %c256_i32 = arith.constant 256 : i32
    %5 = arith.muli %arg1, %c256_i32 : i32
    %6 = tpu.assume_multiple %5, 256 : i32
    %7 = arith.index_cast %6 : i32 to index
    %c0_2 = arith.constant 0 : index
    %8 = vector.load %arg3[%7, %c0_2] : memref<256x64xbf16, #tpu.memory_space<vmem>>, vector<256x64xbf16>
    %c0_3 = arith.constant 0 : index
    %c0_4 = arith.constant 0 : index
    %9 = vector.load %arg9[%c0_3, %c0_4] : memref<128x64xf32, #tpu.memory_space<vmem>>, vector<128x64xf32>
    %cst = arith.constant dense<0.000000e+00> : vector<128x64xf32>
    %10 = tpu.matmul %4, %8, %cst {dimension_numbers = #tpu.dot_dimension_numbers<[1], [0], [0], [1], [0, 0, 1, 1], [], []>} : vector<128x256xbf16>, vector<256x64xbf16>, vector<128x64xf32> -> vector<128x64xf32>
    %11 = arith.addf %9, %10 : vector<128x64xf32>
    %c0_5 = arith.constant 0 : index
    %c0_6 = arith.constant 0 : index
    %12 = vector.load %arg9[%c0_5, %c0_6] : memref<128x64xf32, #tpu.memory_space<vmem>>, vector<128x64xf32>
    tpu.vector_store %arg9[%c0_5, %c0_6], %11 {strides = array<i32>} : memref<128x64xf32, #tpu.memory_space<vmem>>, vector<128x64xf32>,
    %c0_i32_7 = arith.constant 0 : i32
    %13 = arith.cmpi eq, %arg1, %c0_i32_7 : i32
    %14 = arith.extui %13 : i1 to i32
    %c0_i32_8 = arith.constant 0 : i32
    %15 = arith.cmpi ne, %14, %c0_i32_8 : i32
    scf.if %15 {
      %c0_9 = arith.constant 0 : index
      %c0_10 = arith.constant 0 : index
      %16 = vector.load %arg9[%c0_9, %c0_10] : memref<128x64xf32, #tpu.memory_space<vmem>>, vector<128x64xf32>
      %c0_11 = arith.constant 0 : index
      %c0_12 = arith.constant 0 : index
      %17 = vector.load %arg5[%c0_11, %c0_12] : memref<128x1xf32, #tpu.memory_space<vmem>>, vector<128x1xf32>
      %18 = vector.broadcast %17 : vector<128x1xf32> to vector<128x64xf32>
      %19 = arith.mulf %16, %18 : vector<128x64xf32>
      %20 = arith.truncf %19 : vector<128x64xf32> to vector<128x64xbf16>
      %c0_13 = arith.constant 0 : index
      %c0_14 = arith.constant 0 : index
      %21 = vector.load %arg6[%c0_13, %c0_14] : memref<64x128xbf16, #tpu.memory_space<vmem>>, vector<64x128xbf16>
      %cst_15 = arith.constant dense<0.000000e+00> : vector<128x128xf32>
      %22 = tpu.matmul %20, %21, %cst_15 {dimension_numbers = #tpu.dot_dimension_numbers<[1], [0], [0], [1], [0, 0, 1, 1], [], []>} : vector<128x64xbf16>, vector<64x128xbf16>, vector<128x128xf32> -> vector<128x128xf32>
      %c0_16 = arith.constant 0 : index
      %c0_17 = arith.constant 0 : index
      %23 = vector.load %arg4[%c0_16, %c0_17] : memref<128x64xbf16, #tpu.memory_space<vmem>>, vector<128x64xbf16>
      %c0_18 = arith.constant 0 : index
      %c0_19 = arith.constant 0 : index
      %24 = vector.load %arg7[%c0_18, %c0_19] : memref<64x128xbf16, #tpu.memory_space<vmem>>, vector<64x128xbf16>
      %cst_20 = arith.constant dense<0.000000e+00> : vector<128x128xf32>
      %25 = tpu.matmul %23, %24, %cst_20 {dimension_numbers = #tpu.dot_dimension_numbers<[1], [0], [0], [1], [0, 0, 1, 1], [], []>} : vector<128x64xbf16>, vector<64x128xbf16>, vector<128x128xf32> -> vector<128x128xf32>
      %26 = arith.addf %22, %25 : vector<128x128xf32>
      %cst_21 = arith.constant 0.000000e+00 : f32
      %27 = vector.broadcast %cst_21 : f32 to vector<128x128xf32>
      %28 = arith.maximumf %26, %27 : vector<128x128xf32>
      %29 = arith.truncf %28 : vector<128x128xf32> to vector<128x128xbf16>
      %c0_22 = arith.constant 0 : index
      %c0_23 = arith.constant 0 : index
      %30 = vector.load %arg8[%c0_22, %c0_23] : memref<128x128xbf16, #tpu.memory_space<vmem>>, vector<128x128xbf16>
      tpu.vector_store %arg8[%c0_22, %c0_23], %29 {strides = array<i32>} : memref<128x128xbf16, #tpu.memory_space<vmem>>, vector<128x128xbf16>,
    } else {
    }
    return
  }
  func.func @transform_0(%arg0: i32, %arg1: i32) -> (i32, i32) {
    %c0_i32 = arith.constant 0 : i32
    return %arg0, %arg1 : i32, i32
  }
  func.func @transform_1(%arg0: i32, %arg1: i32) -> (i32, i32) {
    %c0_i32 = arith.constant 0 : i32
    %c0_i32_0 = arith.constant 0 : i32
    %c0_i32_1 = arith.constant 0 : i32
    return %c0_i32, %c0_i32_0 : i32, i32
  }
  func.func @transform_2(%arg0: i32, %arg1: i32) -> (i32, i32) {
    %c0_i32 = arith.constant 0 : i32
    %c0_i32_0 = arith.constant 0 : i32
    return %arg0, %c0_i32 : i32, i32
  }
  func.func @transform_3(%arg0: i32, %arg1: i32) -> (i32, i32) {
    %c0_i32 = arith.constant 0 : i32
    %c0_i32_0 = arith.constant 0 : i32
    return %arg0, %c0_i32 : i32, i32
  }
  func.func @transform_4(%arg0: i32, %arg1: i32) -> (i32, i32) {
    %c0_i32 = arith.constant 0 : i32
    %c0_i32_0 = arith.constant 0 : i32
    %c0_i32_1 = arith.constant 0 : i32
    return %c0_i32, %c0_i32_0 : i32, i32
  }
  func.func @transform_5(%arg0: i32, %arg1: i32) -> (i32, i32) {
    %c0_i32 = arith.constant 0 : i32
    %c0_i32_0 = arith.constant 0 : i32
    %c0_i32_1 = arith.constant 0 : i32
    return %c0_i32, %c0_i32_0 : i32, i32
  }
  func.func @transform_6(%arg0: i32, %arg1: i32) -> (i32, i32) {
    %c0_i32 = arith.constant 0 : i32
    %c0_i32_0 = arith.constant 0 : i32
    return %arg0, %c0_i32 : i32, i32
  }
}

</mosaic_0001>

<bundles_post_ra>
// kernel: tpu_custom_call.1
= control target key start
LH: loop header
LB: loop body
LE: loop exit
PB: predicated region body
PF: predicated region fallthrough
CT: control target
= control target key end

     0   :  { %11 = vsyncpa [#allocation4], 0  ;;  %s2157_s0 = inlined_call_operand.vmem [shape: s8[256,256], index: 0, kind: input, shape index: {}]   ;;  %s2158_s1 = inlined_call_operand.vmem [shape: bf16[256,64], index: 1, kind: input, shape index: {}]   ;;  %s2159_s2 = inlined_call_operand.vmem [shape: bf16[256,64], index: 2, kind: input, shape index: {}]   ;;  %s2160_s3 = inlined_call_operand.vmem [shape: f32[256,1], index: 3, kind: input, shape index: {}]   ;;  %s2161_s4 = inlined_call_operand.vmem [shape: bf16[64,128], index: 4, kind: input, shape index: {}]   ;;  %s2162_s5 = inlined_call_operand.vmem [shape: bf16[64,128], index: 5, kind: input, shape index: {}]   ;;  %s2163_s6 = inlined_call_operand.hbm [shape: bf16[256,128], index: 6, kind: output, shape index: {}]  }
   0x1   :  { %13 = vsyncpa [#allocation4 + $0x1], 0  ;;  %s1860_s21 = smov 0   ;;  %s1862_s22 = smov 0  }
   0x2   :  { %s1864_s23 = smov 0   ;;  %s1866_s24 = smov 0  }
   0x3   :  { %s1868_s25 = smov 0   ;;  %s1870_s26 = smov 0  }
   0x4 LB: > { %s1366_s27 = sadd.s32 4294967295, %s1818_s26   ;;  %s1367_s28 = sadd.s32 4294967294, %s1818_s26   ;;  %s1818_s26 = sphi %s1870_s26, %s19_s26   ;;  %s1814_s25 = sphi %s1868_s25, %s2170_s25   ;;  %s1810_s24 = sphi %s1866_s24, %s2169_s24   ;;  %s1806_s23 = sphi %s1864_s23, %s2168_s23   ;;  %s1802_s22 = sphi %s1862_s22, %s2167_s22   ;;  %s1798_s21 = sphi %s1860_s21, %s2166_s21  }
   0x5   : > { %s31_s29 = sadd.s32 1, %s1814_s25  ;;  %s181_s30 = sadd.s32 1, %s1806_s23 }
   0x6   : > { %p33_p0 = scmp.ge.s32.totalorder %s31_s29, 2  ;;  %p191_p1 = scmp.ne.s32.totalorder %s1806_s23, %s1802_s22 }
   0x7   : > { %p192_p2 = scmp.eq.s32.totalorder %s1366_s27, 1  ;;  %p197_p3 = scmp.ne.s32.totalorder %s1802_s22, %s1798_s21 }
   0x8   : > { %s2172_s29 = smov (%p33_p0, %s31_s29), 0  ;;  %p198_p5 = scmp.eq.s32.totalorder %s1367_s28, 1 }
   0x9   : > { %p1900_p4 = por %p192_p2, %p191_p1  ;;  %s178_s8 = ssub.s32 %s1814_s25, %s2172_s29 }
   0xa   : > { %p1370_p6 = scmp.ge.s32.totalorder %s1818_s26, 1  ;;  %p179_p7 = scmp.eq.s32.totalorder %s178_s8, 0 }
   0xb   : > { %p1907_p8 = por %p198_p5, %p197_p3  ;;  %p258_p9 = scmp.lt.s32.totalorder %s1818_s26, 3 }
   0xc   : > { %s1913_s10 = scalar_select %p179_p7, %s1806_s23, %s181_s30  }
   0xd   : > { %p259_p10 = pnand %p1370_p6, %p258_p9 }
   0xe   : > { %s1372_s13 = sshll.u32 (!%p259_p10), %s1810_s24, 2  ;;  %s1375_s28 = sshll.u32 (!%p259_p10), %s1810_s24, 4 }
   0xf   : > { %262 = sbr.rel (%p259_p10) target bundleno = 543 (0x21f), region = 44  ;;  %p305_p11 = scmp.lt.s32.totalorder (!%p259_p10), %s1372_s13, 7 }
  0x10   : > { %p316_p12 = scmp.lt.s32.totalorder (!%p259_p10), %s1375_s28, 31  ;;  %s300_s8 = sand.u32 (!%p259_p10), 1, %s1802_s22  }
  0x11   : > { %s1465_s12 = sshll.u32 (!%p259_p10), %s1810_s24, 10  ;;  %s1822_s17 = smov (!%p259_p10), [#allocation3]  }
  0x12   : > { %s1746_s18 = sshll.u32 (!%p259_p10), %s1822_s17, 4  ;;  %s1747_s18 = int_to_ptr.vmem [resolvable:$false] %s1746_s18 }
  0x14   : > { %v1710_v0 = vld [vmem:[%s2158_s1 + $0x78] sm:$0xff]   ;;  %v1712_v2 = vld [vmem:[%s2158_s1 + $0x70] sm:$0xff]   ;;  %v1820_v4 = vmov 0   ;;  %v1714_v5 = vld [vmem:[%s2158_s1 + $0x68] sm:$0xff]   ;;  %s2174_s13 = smov (!%p305_p11, %s1372_s13), 7  ;;  %s2176_s28 = smov (!%p316_p12, %s1375_s28), 31 }
  0x15   : > { %v1711_v1 = vld [vmem:[%s2158_s1 + $0x38] sm:$0xff]   ;;  %1513 = vmatprep.subr.bf16.mxu0 %v1710_v0  ;;  %v1713_v3 = vld [vmem:[%s2158_s1 + $0x30] sm:$0xff]   ;;  %1708 = vset.pattern.permute.xlu0 %v1820_v4  ;;  %v1715_v6 = vld [vmem:[%s2158_s1 + $0x28] sm:$0xff]   ;;  %s1448_s14 = sshll.u32 %s2174_s13, 4  ;;  %s1378_s19 = sshll.u32 %s2176_s28, 3  ;;  %vm333_vm0 = vcmask 523264  }
  0x16   : > { %1514 = vmatpush3.bf16.msra.mxu0 %v1711_v1  ;;  %1709 = vset.pattern.permute.xlu1 %v1820_v4  ;;  %v1716_v7 = vld [vmem:[%s2158_s1 + $0x60] sm:$0xff]   ;;  %v1718_v9 = vld [vmem:[%s2158_s1 + $0x58] sm:$0xff]   ;;  %s1950_s30 = scalar_lea.vmem %s2157_s0, %s1448_s14  ;;  %s1958_s15 = scalar_lea.vmem %s2160_s3, %s1378_s19  ;;  %v1720_v11 = vld [vmem:[%s2158_s1 + $0x50] sm:$0xff]   ;;  %v1821_v63 = vmov 0.0  }
  0x17   : > { %1515 = vmatprep.subr.bf16.mxu0 %v1712_v2  ;;  %v1717_v8 = vld [vmem:[%s2158_s1 + $0x20] sm:$0xff]   ;;  %v1719_v10 = vld [vmem:[%s2158_s1 + $0x18] sm:$0xff]   ;;  %v351_v12 = vld [vmem:[%s1950_s30 + $0x8] sm:$0xff]  ;;  %s1376_s27 = sshll.u32 %s2176_s28, 2  ;;  %334 = vst.msk [vmem:[#allocation2] sm:$0xff] %vm333_vm0, %v1821_v63  ;;  %s2112_s14 = scalar_lea.sflag [#allocation4], %s300_s8 }
  0x18   : > { %v359_v13 = vunpack.c.l.s8.bf16 %v351_v12  ;;  %v672_v14 = vld [vmem:[%s1958_s15] sm:$0xff]  ;;  %v1721_v15 = vld [vmem:[%s2158_s1 + $0x10] sm:$0xff]   ;;  %v1722_v17 = vld [vmem:[%s2158_s1 + $0x48] sm:$0xff]   ;;  %s1995_s13 = scalar_lea.vmem %s2159_s2, %s1376_s27  ;;  %v361_v34 = vunpack.c.h.s8.bf16 %v351_v12  ;;  %335 = vst.msk [vmem:[#allocation2 + $0x8] sm:$0xff] %vm333_vm0, %v1821_v63  ;;  %s1748_s28 = scalar_lea.vmem %s1747_s18, 2048 }
  0x19   : > { %v674_v16 = vld [vmem:[%s1958_s15 + $0x10] sm:$0xff]  ;;  %690 = vperm.xlu0 %1708, %v672_v14   ;;  %v673_v18 = vld [vmem:[%s1958_s15 + $0x8] sm:$0xff]  ;;  %v675_v19 = vld [vmem:[%s1958_s15 + $0x18] sm:$0xff]  ;;  %336 = vst.msk [vmem:[#allocation2 + $0x10] sm:$0xff] %vm333_vm0, %v1821_v63 }
  0x1a   : > { %1516 = vmatpush3.bf16.msra.mxu0 %v1713_v3  ;;  %555 = vmatprep.mubr.bf16.mxu0 %v359_v13  ;;  %v1723_v20 = vld [vmem:[%s2158_s1 + $0x8] sm:$0xff]   ;;  %v1724_v21 = vld [vmem:[%s2158_s1 + $0x40] sm:$0xff]   ;;  %v1726_v23 = vld [vmem:[%s2162_s5 + $0x18] sm:$0xff]   ;;  %337 = vst.msk [vmem:[#allocation2 + $0x18] sm:$0xff] %vm333_vm0, %v1821_v63 }
  0x1b   : > { %1517 = vmatprep.subr.bf16.mxu0 %v1714_v5  ;;  %700 = vperm.xlu1 %1709, %v674_v16   ;;  %v676_v22 = vld [vmem:[%s1958_s15 + $0x20] sm:$0xff]  ;;  %v1727_v26 = vld [vmem:[%s2162_s5 + $0x10] sm:$0xff]   ;;  %v677_v27 = vld [vmem:[%s1958_s15 + $0x28] sm:$0xff]  ;;  %338 = vst.msk [vmem:[#allocation2 + $0x20] sm:$0xff] %vm333_vm0, %v1821_v63 }
  0x1c   : > { %v1725_v24 = vld [vmem:[%s2158_s1] sm:$0xff]   ;;  %1601 = vmatprep.subr.bf16.mxu1 %v1726_v23  ;;  %v678_v28 = vld [vmem:[%s1958_s15 + $0x30] sm:$0xff]  ;;  %v1728_v29 = vld [vmem:[%s2162_s5 + $0x8] sm:$0xff]   ;;  %339 = vst.msk [vmem:[#allocation2 + $0x28] sm:$0xff] %vm333_vm0, %v1821_v63 }
  0x1d   : > { %695 = vperm.xlu0 %1708, %v673_v18   ;;  %v350_v25 = vld [vmem:[%s1950_s30] sm:$0xff]  ;;  %1602 = vmatpush3.bf16.msra.mxu1 %v1726_v23  ;;  %v679_v31 = vld [vmem:[%s1958_s15 + $0x38] sm:$0xff]  ;;  %v681_v36 = vld [vmem:[%s1958_s15 + $0x48] sm:$0xff]  ;;  %340 = vst.msk [vmem:[#allocation2 + $0x30] sm:$0xff] %vm333_vm0, %v1821_v63 }
  0x1e   : > { %1518 = vmatpush3.bf16.msra.mxu0 %v1715_v6  ;;  %v1730_v30 = vld [vmem:[%s1995_s13] sm:$0xff]   ;;  %1603 = vmatprep.subr.bf16.mxu1 %v1727_v26  ;;  %v358_v32 = vunpack.c.l.s8.bf16 %v350_v25  ;;  %v353_v37 = vld [vmem:[%s1950_s30 + $0x18] sm:$0xff]  ;;  %v682_v38 = vld [vmem:[%s1958_s15 + $0x50] sm:$0xff]  ;;  %v360_v39 = vunpack.c.h.s8.bf16 %v350_v25  ;;  %341 = vst.msk [vmem:[#allocation2 + $0x38] sm:$0xff] %vm333_vm0, %v1821_v63 }
  0x1f   : > { %1519 = vmatprep.subr.bf16.mxu0 %v1716_v7  ;;  %705 = vperm.xlu1 %1709, %v675_v19   ;;  %v1729_v33 = vld [vmem:[%s2162_s5] sm:$0xff]   ;;  %v683_v40 = vld [vmem:[%s1958_s15 + $0x58] sm:$0xff]  ;;  %v1731_v41 = vld [vmem:[%s1995_s13 + $0x8] sm:$0xff]   ;;  %v363_v42 = vunpack.c.l.s8.bf16 %v353_v37  ;;  %v365_v49 = vunpack.c.h.s8.bf16 %v353_v37  ;;  %342 = vst.msk [vmem:[#allocation2 + $0x40] sm:$0xff] %vm333_vm0, %v1821_v63 }
  0x20   : > { %1609 = vmatprep.mubr.msk.bf16.mxu1 %vm333_vm0, %v1730_v30  ;;  %v680_v35 = vld [vmem:[%s1958_s15 + $0x40] sm:$0xff]  ;;  %v685_v44 = vld [vmem:[%s1958_s15 + $0x68] sm:$0xff]  ;;  %v352_v45 = vld [vmem:[%s1950_s30 + $0x10] sm:$0xff]  ;;  %343 = vst.msk [vmem:[#allocation2 + $0x48] sm:$0xff] %vm333_vm0, %v1821_v63 }
  0x21   : > { %710 = vperm.xlu0 %1708, %v676_v22   ;;  %1604 = vmatpush3.bf16.msra.mxu1 %v1727_v26  ;;  %v684_v43 = vld [vmem:[%s1958_s15 + $0x60] sm:$0xff]  ;;  %v686_v46 = vld [vmem:[%s1958_s15 + $0x70] sm:$0xff]  ;;  %v362_v47 = vunpack.c.l.s8.bf16 %v352_v45  ;;  %v687_v48 = vld [vmem:[%s1958_s15 + $0x78] sm:$0xff]  ;;  %v364_v51 = vunpack.c.h.s8.bf16 %v352_v45  ;;  %344 = vst.msk [vmem:[#allocation2 + $0x50] sm:$0xff] %vm333_vm0, %v1821_v63  ;;  %s2104_s15 = scalar_lea.hbm %s2163_s6, %s1465_s12 }
  0x22   : > { %1520 = vmatpush3.bf16.msra.mxu0 %v1717_v8  ;;  %1605 = vmatprep.subr.bf16.mxu1 %v1728_v29  ;;  %v355_v50 = vld [vmem:[%s1950_s30 + $0x28] sm:$0xff]  ;;  %v354_v53 = vld [vmem:[%s1950_s30 + $0x20] sm:$0xff]  ;;  %v357_v56 = vld [vmem:[%s1950_s30 + $0x38] sm:$0xff]  ;;  %345 = vst.msk [vmem:[#allocation2 + $0x58] sm:$0xff] %vm333_vm0, %v1821_v63 }
  0x23   : > { %1521 = vmatprep.subr.bf16.mxu0 %v1718_v9  ;;  %715 = vperm.xlu1 %1709, %v677_v27   ;;  %v367_v52 = vunpack.c.l.s8.bf16 %v355_v50  ;;  %v366_v54 = vunpack.c.l.s8.bf16 %v354_v53  ;;  %v369_v55 = vunpack.c.h.s8.bf16 %v355_v50  ;;  %v368_v57 = vunpack.c.h.s8.bf16 %v354_v53  ;;  %v356_v59 = vld [vmem:[%s1950_s30 + $0x30] sm:$0xff]  ;;  %346 = vst.msk [vmem:[#allocation2 + $0x60] sm:$0xff] %vm333_vm0, %v1821_v63  ;;  %347 = vst.msk [vmem:[#allocation2 + $0x68] sm:$0xff] %vm333_vm0, %v1821_v63  ;;  %v1733_v1 = vld [vmem:[%s1995_s13 + $0x18] sm:$0xff]  }
  0x24   : > { %v371_v58 = vunpack.c.l.s8.bf16 %v357_v56  ;;  %v370_v60 = vunpack.c.l.s8.bf16 %v356_v59  ;;  %v373_v61 = vunpack.c.h.s8.bf16 %v357_v56  ;;  %v372_v62 = vunpack.c.h.s8.bf16 %v356_v59  ;;  %348 = vst.msk [vmem:[#allocation2 + $0x70] sm:$0xff] %vm333_vm0, %v1821_v63  ;;  %349 = vst.msk [vmem:[#allocation2 + $0x78] sm:$0xff] %vm333_vm0, %v1821_v63  ;;  %v1732_v0 = vld [vmem:[%s1995_s13 + $0x10] sm:$0xff]   ;;  %v1734_v2 = vld [vmem:[%s1995_s13 + $0x20] sm:$0xff]  }
  0x25   : > { %720 = vperm.xlu0 %1708, %v678_v28   ;;  %1606 = vmatpush3.bf16.msra.mxu1 %v1728_v29  ;;  %v1735_v3 = vld [vmem:[%s1995_s13 + $0x28] sm:$0xff]   ;;  %v1736_v4 = vld [vmem:[%s2161_s4 + $0x18] sm:$0xff]   ;;  %v1737_v5 = vld [vmem:[%s2161_s4 + $0x10] sm:$0xff]  }
  0x26   : > { %1522 = vmatpush3.bf16.msra.mxu0 %v1719_v10  ;;  %1607 = vmatprep.subr.bf16.mxu1 %v1729_v33  ;;  %v1738_v6 = vld [vmem:[%s1995_s13 + $0x30] sm:$0xff]   ;;  %v1739_v7 = vld [vmem:[%s1995_s13 + $0x38] sm:$0xff]   ;;  %v1740_v8 = vld [vmem:[%s2161_s4 + $0x8] sm:$0xff]   ;;  %s1371_s13 = sshll.u32 %s300_s8, 6 }
  0x27   : > { %1523 = vmatprep.subr.bf16.mxu0 %v1720_v11  ;;  %725 = vperm.xlu1 %1709, %v679_v31   ;;  %v1741_v9 = vld [vmem:[%s2161_s4] sm:$0xff]   ;;  %v412_v16 = vld [vmem:[#allocation2 + $0x8] sm:$0xff]  ;;  %v414_v27 = vld [vmem:[#allocation2 + $0x18] sm:$0xff]  ;;  %s2091_s11 = scalar_lea.vmem [#allocation3], %s1371_s13 }
  0x28   : > { %v411_v11 = vld [vmem:[#allocation2] sm:$0xff]  ;;  %s1264_s27 = sshll.u32 %s2091_s11, 4  ;;  %s2106_s27 = int_to_ptr.vmem [resolvable:$true] %s1264_s27 }
  0x29   : > { %730 = vperm.xlu0 %1708, %v680_v35   ;;  %1608 = vmatpush3.bf16.msra.mxu1 %v1729_v33  ;;  %v415_v35 = vld [vmem:[#allocation2 + $0x20] sm:$0xff]  ;;  %s1742_s24 = scalar_lea.vmem %s2106_s27, 1024  ;;  %p1749_p2 = scmp.lt.s32.totalorder %s2106_s27, %s1747_s18 }
  0x2a   : > { %1524 = vmatpush3.bf16.msra.mxu0 %v1721_v15  ;;  %1625 = vmatprep.subr.bf16.mxu1 %v1736_v4  ;;  %p1743_p13 = scmp.ne.s32.totalorder %s2106_s27, %s1742_s24  ;;  %p1750_p3 = scmp.lt.s32.totalorder %s1748_s28, %s1742_s24 }
  0x2b   : > { %1525 = vmatprep.subr.bf16.mxu0 %v1722_v17  ;;  %735 = vperm.xlu1 %1709, %v681_v36  }
  0x2c   : > { %1610 = vmatmul.mubr.msk.bf16.vlgmr.msra.gmra.mxu1 %vm333_vm0, %v1731_v41  ;;  %p1744_p0 = pnand %p1743_p13, %p1900_p4  ;;  %p1751_p5 = por %p1750_p3, %p1749_p2 }
  0x2d   : > { %740 = vperm.xlu0 %1708, %v682_v38   ;;  %1613 = vmatprep.mubr.msk.bf16.mxu1 %vm333_vm0, %v1732_v0 }
  0x2e   : > { %1526 = vmatpush3.bf16.msra.mxu0 %v1723_v20  ;;  %1626 = vmatpush3.bf16.msra.mxu1 %v1736_v4  ;;  %p1745_p1 = pneg %p1744_p0 }
  0x2f   : > { %1527 = vmatprep.subr.bf16.mxu0 %v1724_v21  ;;  %745 = vperm.xlu1 %1709, %v683_v40   ;;  %v413_v21 = vld [vmem:[#allocation2 + $0x10] sm:$0xff] }
  0x30   : > { %1627 = vmatprep.subr.bf16.mxu1 %v1737_v5  ;;  %p1752_p6 = pnand %p1751_p5, %p1745_p1 }
  0x31   : > { %750 = vperm.xlu0 %1708, %v684_v43  }
  0x32   : > { %1528 = vmatpush3.bf16.msra.mxu0 %v1725_v24  ;;  %1628 = vmatpush3.bf16.msra.mxu1 %v1737_v5  ;;  %v419_v5 = vld [vmem:[#allocation2 + $0x40] sm:$0xff] }
  0x33   : > { %755 = vperm.xlu1 %1709, %v685_v44   ;;  %1629 = vmatprep.subr.bf16.mxu1 %v1740_v8  ;;  %v416_v44 = vld [vmem:[#allocation2 + $0x28] sm:$0xff] }
  0x34   : > { %1614 = vmatmul.mubr.msk.bf16.gmra.mxu1 %vm333_vm0, %v1733_v1 }
  0x35   : > { %556 = vmatmul.mubr.bf16.vlgmr.msra.gmra.mxu0 %v358_v32  ;;  %760 = vperm.xlu0 %1708, %v686_v46  }
  0x36   : > { %563 = vmatprep.mubr.bf16.mxu0 %v361_v34  ;;  %1617 = vmatprep.mubr.msk.bf16.mxu1 %vm333_vm0, %v1734_v2 }
  0x37   : > { %765 = vperm.xlu1 %1709, %v687_v48   ;;  %1630 = vmatpush3.bf16.msra.mxu1 %v1740_v8 }
  0x38   : > { %1631 = vmatprep.subr.bf16.mxu1 %v1741_v9 }
  0x3b   : > { %1632 = vmatpush3.bf16.msra.mxu1 %v1741_v9 }
  0x3c   : > { %1618 = vmatmul.mubr.msk.bf16.gmra.mxu1 %vm333_vm0, %v1735_v3 }
  0x3d   : > { %564 = vmatmul.mubr.bf16.gmra.mxu0 %v360_v39  ;;  %1621 = vmatprep.mubr.msk.bf16.mxu1 %vm333_vm0, %v1738_v6 }
  0x3e   : > { %571 = vmatprep.mubr.bf16.mxu0 %v363_v42 }
  0x44   : > { %1622 = vmatmul.mubr.msk.bf16.gmra.mxu1 %vm333_vm0, %v1739_v7 }
  0x45   : > { %572 = vmatmul.mubr.bf16.gmra.mxu0 %v362_v47 }
  0x46   : > { %579 = vmatprep.mubr.bf16.mxu0 %v365_v49 }
  0x4d   : > { %580 = vmatmul.mubr.bf16.gmra.mxu0 %v364_v51 }
  0x4e   : > { %587 = vmatprep.mubr.bf16.mxu0 %v367_v52  ;;  %v417_v52 = vld [vmem:[#allocation2 + $0x30] sm:$0xff] }
  0x55   : > { %588 = vmatmul.mubr.bf16.gmra.mxu0 %v366_v54 }
  0x56   : > { %595 = vmatprep.mubr.bf16.mxu0 %v369_v55 }
  0x5d   : > { %596 = vmatmul.mubr.bf16.gmra.mxu0 %v368_v57 }
  0x5e   : > { %603 = vmatprep.mubr.bf16.mxu0 %v371_v58 }
  0x65   : > { %604 = vmatmul.mubr.bf16.gmra.mxu0 %v370_v60  ;;  %v418_v60 = vld [vmem:[#allocation2 + $0x38] sm:$0xff] }
  0x66   : > { %611 = vmatprep.mubr.bf16.mxu0 %v373_v61 }
  0x6d   : > { %612 = vmatmul.mubr.bf16.gmra.mxu0 %v372_v62 }
  0x94   : > { %v691_v23 = vpop.permute.xlu0 %690 }
  0x96   : > { %v701_v40 = vpop.permute.xlu1 %700 }
  0x98   : > { %v696_v32 = vpop.permute.xlu0 %695 }
  0x9a   : > { %v706_v50 = vpop.permute.xlu1 %705 }
  0x9c   : > { %v711_v1 = vpop.permute.xlu0 %710 }
  0x9e   : > { %v716_v3 = vpop.permute.xlu1 %715 }
  0xf5   : > { %v1529_v10 = vpop.f32.mrf.mxu0 }
  0xf7   : > { %v1530_v12 = vpop.f32.mrf.mxu0 }
  0xf8   : > { %v1531_v13 = vadd.f32 %v1530_v12, %v1529_v10 }
  0xf9   : > { %v1532_v14 = vpop.f32.mrf.mxu0 }
  0xfa   : > { %v620_v15 = vadd.f32 %v1531_v13, %v411_v11  ;;  %v420_v13 = vld [vmem:[#allocation2 + $0x48] sm:$0xff] }
  0xfb   : > { %v1533_v17 = vpop.f32.mrf.mxu0 }
  0xfc   : > { %637 = vst.msk [vmem:[#allocation2] sm:$0xff] %vm333_vm0, %v620_v15  ;;  %v1534_v18 = vadd.f32 %v1533_v17, %v1532_v14 }
  0xfd   : > { %v1535_v19 = vpop.f32.mrf.mxu0 }
  0xfe   : > { %v621_v20 = vadd.f32 %v1534_v18, %v412_v16  ;;  %v721_v18 = vpop.permute.xlu0 %720 }
  0xff   : > { %v1536_v22 = vpop.f32.mrf.mxu0 }
 0x100   : > { %638 = vst.msk [vmem:[#allocation2 + $0x8] sm:$0xff] %vm333_vm0, %v621_v20  ;;  %v1537_v24 = vadd.f32 %v1536_v22, %v1535_v19  ;;  %v726_v20 = vpop.permute.xlu1 %725 }
 0x101   : > { %v1538_v25 = vpop.f32.mrf.mxu0 }
 0x102   : > { %v622_v26 = vadd.f32 %v1537_v24, %v413_v21  ;;  %v421_v21 = vld [vmem:[#allocation2 + $0x50] sm:$0xff] }
 0x103   : > { %v1539_v28 = vpop.f32.mrf.mxu0  ;;  %v656_v30 = vld [vmem:[#allocation2] sm:$0xff] }
 0x104   : > { %639 = vst.msk [vmem:[#allocation2 + $0x10] sm:$0xff] %vm333_vm0, %v622_v26  ;;  %v1540_v29 = vadd.f32 %v1539_v28, %v1538_v25  ;;  %v768_v37 = vmul.f32 %v691_v23, %v656_v30  ;;  %v422_v30 = vld [vmem:[#allocation2 + $0x58] sm:$0xff] }
 0x105   : > { %v1541_v31 = vpop.f32.mrf.mxu0 }
 0x106   : > { %v623_v33 = vadd.f32 %v1540_v29, %v414_v27 }
 0x107   : > { %v657_v34 = vld [vmem:[#allocation2 + $0x8] sm:$0xff]  ;;  %v1542_v36 = vpop.f32.mrf.mxu0 }
 0x108   : > { %640 = vst.msk [vmem:[#allocation2 + $0x18] sm:$0xff] %vm333_vm0, %v623_v33  ;;  %v769_v38 = vmul.f32 %v696_v32, %v657_v34  ;;  %v1543_v39 = vadd.f32 %v1542_v36, %v1541_v31 }
 0x109   : > { %v1544_v41 = vpop.f32.mrf.mxu0 }
 0x10a   : > { %v784_v42 = vpack.c.bf16 %v769_v38, %v768_v37  ;;  %v624_v43 = vadd.f32 %v1543_v39, %v415_v35  ;;  %v731_v35 = vpop.permute.xlu0 %730  ;;  %v736_v37 = vpop.permute.xlu1 %735  ;;  %v423_v38 = vld [vmem:[#allocation2 + $0x60] sm:$0xff] }
 0x10b   : > { %v1545_v45 = vpop.f32.mrf.mxu0  ;;  %v658_v47 = vld [vmem:[#allocation2 + $0x10] sm:$0xff] }
 0x10c   : > { %641 = vst.msk [vmem:[#allocation2 + $0x20] sm:$0xff] %vm333_vm0, %v624_v43  ;;  %v1546_v46 = vadd.f32 %v1545_v45, %v1544_v41  ;;  %1633 = vmatprep.mubr.msk.bf16.mxu1 %vm333_vm0, %v784_v42  ;;  %v770_v54 = vmul.f32 %v701_v40, %v658_v47  ;;  %v424_v47 = vld [vmem:[#allocation2 + $0x68] sm:$0xff] }
 0x10d   : > { %v1547_v48 = vpop.f32.mrf.mxu0 }
 0x10e   : > { %v625_v49 = vadd.f32 %v1546_v46, %v416_v44 }
 0x10f   : > { %v659_v51 = vld [vmem:[#allocation2 + $0x18] sm:$0xff]  ;;  %v1548_v53 = vpop.f32.mrf.mxu0 }
 0x110   : > { %v771_v55 = vmul.f32 %v706_v50, %v659_v51  ;;  %642 = vst.msk [vmem:[#allocation2 + $0x28] sm:$0xff] %vm333_vm0, %v625_v49  ;;  %v1549_v56 = vadd.f32 %v1548_v53, %v1547_v48 }
 0x111   : > { %v1550_v57 = vpop.f32.mrf.mxu0 }
 0x112   : > { %v785_v58 = vpack.c.bf16 %v771_v55, %v770_v54  ;;  %v626_v59 = vadd.f32 %v1549_v56, %v417_v52  ;;  %v741_v52 = vpop.permute.xlu0 %740  ;;  %v746_v54 = vpop.permute.xlu1 %745  ;;  %v425_v55 = vld [vmem:[#allocation2 + $0x70] sm:$0xff] }
 0x113   : > { %v1551_v61 = vpop.f32.mrf.mxu0  ;;  %v660_v63 = vld [vmem:[#allocation2 + $0x20] sm:$0xff] }
 0x114   : > { %643 = vst.msk [vmem:[#allocation2 + $0x30] sm:$0xff] %vm333_vm0, %v626_v59  ;;  %v1552_v62 = vadd.f32 %v1551_v61, %v1550_v57  ;;  %1634 = vmatmul.mubr.msk.bf16.vlgmr.msra.gmra.mxu1 %vm333_vm0, %v785_v58  ;;  %v772_v7 = vmul.f32 %v711_v1, %v660_v63 }
 0x115   : > { %v1553_v0 = vpop.f32.mrf.mxu0 }
 0x116   : > { %v627_v2 = vadd.f32 %v1552_v62, %v418_v60 }
 0x117   : > { %v661_v4 = vld [vmem:[#allocation2 + $0x28] sm:$0xff]  ;;  %v1554_v6 = vpop.f32.mrf.mxu0 }
 0x118   : > { %v773_v8 = vmul.f32 %v716_v3, %v661_v4  ;;  %644 = vst.msk [vmem:[#allocation2 + $0x38] sm:$0xff] %vm333_vm0, %v627_v2  ;;  %v1555_v9 = vadd.f32 %v1554_v6, %v1553_v0  ;;  %v426_v0 = vld [vmem:[#allocation2 + $0x78] sm:$0xff]  ;;  %v756_v6 = vpop.permute.xlu1 %755 }
 0x119   : > { %v1556_v10 = vpop.f32.mrf.mxu0 }
 0x11a   : > { %v786_v11 = vpack.c.bf16 %v773_v8, %v772_v7  ;;  %v628_v12 = vadd.f32 %v1555_v9, %v419_v5  ;;  %v751_v5 = vpop.permute.xlu0 %750 }
 0x11b   : > { %v1557_v14 = vpop.f32.mrf.mxu0  ;;  %v662_v16 = vld [vmem:[#allocation2 + $0x30] sm:$0xff] }
 0x11c   : > { %645 = vst.msk [vmem:[#allocation2 + $0x40] sm:$0xff] %vm333_vm0, %v628_v12  ;;  %v1558_v15 = vadd.f32 %v1557_v14, %v1556_v10  ;;  %1637 = vmatprep.mubr.msk.bf16.mxu1 %vm333_vm0, %v786_v11  ;;  %v774_v24 = vmul.f32 %v721_v18, %v662_v16  ;;  %v1611_v18 = vpop.f32.mrf.mxu1 }
 0x11d   : > { %v1559_v17 = vpop.f32.mrf.mxu0 }
 0x11e   : > { %v629_v19 = vadd.f32 %v1558_v15, %v420_v13  ;;  %v761_v12 = vpop.permute.xlu0 %760  ;;  %v766_v13 = vpop.permute.xlu1 %765 }
 0x11f   : > { %v1560_v22 = vpop.f32.mrf.mxu0  ;;  %v663_v23 = vld [vmem:[#allocation2 + $0x38] sm:$0xff] }
 0x120   : > { %646 = vst.msk [vmem:[#allocation2 + $0x48] sm:$0xff] %vm333_vm0, %v629_v19  ;;  %v1561_v25 = vadd.f32 %v1560_v22, %v1559_v17  ;;  %v775_v26 = vmul.f32 %v726_v20, %v663_v23  ;;  %v946_v19 = vpop.f32.mrf.mxu1 }
 0x121   : > { %v1562_v27 = vpop.f32.mrf.mxu0 }
 0x122   : > { %v630_v28 = vadd.f32 %v1561_v25, %v421_v21  ;;  %v787_v29 = vpack.c.bf16 %v775_v26, %v774_v24  ;;  %v1612_v20 = vpop.f32.mrf.mxu1 }
 0x123   : > { %v1563_v31 = vpop.f32.mrf.mxu0  ;;  %v664_v34 = vld [vmem:[#allocation2 + $0x40] sm:$0xff] }
 0x124   : > { %647 = vst.msk [vmem:[#allocation2 + $0x50] sm:$0xff] %vm333_vm0, %v630_v28  ;;  %v1564_v32 = vadd.f32 %v1563_v31, %v1562_v27  ;;  %1638 = vmatmul.mubr.msk.bf16.gmra.mxu1 %vm333_vm0, %v787_v29  ;;  %v776_v42 = vmul.f32 %v731_v35, %v664_v34  ;;  %v949_v21 = vpop.f32.mrf.mxu1 }
 0x125   : > { %v1565_v33 = vpop.f32.mrf.mxu0 }
 0x126   : > { %v631_v36 = vadd.f32 %v1564_v32, %v422_v30  ;;  %v1615_v22 = vpop.f32.mrf.mxu1 }
 0x127   : > { %v1566_v39 = vpop.f32.mrf.mxu0  ;;  %v665_v40 = vld [vmem:[#allocation2 + $0x48] sm:$0xff] }
 0x128   : > { %648 = vst.msk [vmem:[#allocation2 + $0x58] sm:$0xff] %vm333_vm0, %v631_v36  ;;  %v1567_v41 = vadd.f32 %v1566_v39, %v1565_v33  ;;  %v777_v43 = vmul.f32 %v736_v37, %v665_v40  ;;  %v962_v23 = vpop.f32.mrf.mxu1 }
 0x129   : > { %v1568_v44 = vpop.f32.mrf.mxu0 }
 0x12a   : > { %v632_v45 = vadd.f32 %v1567_v41, %v423_v38  ;;  %v788_v46 = vpack.c.bf16 %v777_v43, %v776_v42  ;;  %v1616_v24 = vpop.f32.mrf.mxu1 }
 0x12b   : > { %v1569_v48 = vpop.f32.mrf.mxu0  ;;  %v666_v51 = vld [vmem:[#allocation2 + $0x50] sm:$0xff] }
 0x12c   : > { %649 = vst.msk [vmem:[#allocation2 + $0x60] sm:$0xff] %vm333_vm0, %v632_v45  ;;  %v1570_v49 = vadd.f32 %v1569_v48, %v1568_v44  ;;  %1641 = vmatprep.mubr.msk.bf16.mxu1 %vm333_vm0, %v788_v46  ;;  %v778_v59 = vmul.f32 %v741_v52, %v666_v51  ;;  %v965_v25 = vpop.f32.mrf.mxu1 }
 0x12d   : > { %v1571_v50 = vpop.f32.mrf.mxu0 }
 0x12e   : > { %v633_v53 = vadd.f32 %v1570_v49, %v424_v47  ;;  %v1619_v26 = vpop.f32.mrf.mxu1 }
 0x12f   : > { %v1572_v56 = vpop.f32.mrf.mxu0  ;;  %v667_v57 = vld [vmem:[#allocation2 + $0x58] sm:$0xff] }
 0x130   : > { %650 = vst.msk [vmem:[#allocation2 + $0x68] sm:$0xff] %vm333_vm0, %v633_v53  ;;  %v1573_v58 = vadd.f32 %v1572_v56, %v1571_v50  ;;  %v779_v60 = vmul.f32 %v746_v54, %v667_v57  ;;  %v978_v27 = vpop.f32.mrf.mxu1 }
 0x131   : > { %v1574_v61 = vpop.f32.mrf.mxu0 }
 0x132   : > { %v634_v62 = vadd.f32 %v1573_v58, %v425_v55  ;;  %v789_v63 = vpack.c.bf16 %v779_v60, %v778_v59  ;;  %v1620_v28 = vpop.f32.mrf.mxu1 }
 0x133   : > { %v1575_v1 = vpop.f32.mrf.mxu0  ;;  %v668_v3 = vld [vmem:[#allocation2 + $0x60] sm:$0xff] }
 0x134   : > { %651 = vst.msk [vmem:[#allocation2 + $0x70] sm:$0xff] %vm333_vm0, %v634_v62  ;;  %v1576_v2 = vadd.f32 %v1575_v1, %v1574_v61  ;;  %1642 = vmatmul.mubr.msk.bf16.gmra.mxu1 %vm333_vm0, %v789_v63  ;;  %v780_v8 = vmul.f32 %v751_v5, %v668_v3  ;;  %v981_v29 = vpop.f32.mrf.mxu1 }
 0x136   : > { %v635_v4 = vadd.f32 %v1576_v2, %v426_v0  ;;  %v1623_v30 = vpop.f32.mrf.mxu1 }
 0x137   : > { %v669_v7 = vld [vmem:[#allocation2 + $0x68] sm:$0xff] }
 0x138   : > { %652 = vst.msk [vmem:[#allocation2 + $0x78] sm:$0xff] %vm333_vm0, %v635_v4  ;;  %v781_v9 = vmul.f32 %v756_v6, %v669_v7  ;;  %v994_v31 = vpop.f32.mrf.mxu1 }
 0x13a   : > { %v790_v10 = vpack.c.bf16 %v781_v9, %v780_v8  ;;  %v1624_v32 = vpop.f32.mrf.mxu1 }
 0x13b   : > { %v670_v11 = vld [vmem:[#allocation2 + $0x70] sm:$0xff] }
 0x13c   : > { %1645 = vmatprep.mubr.msk.bf16.mxu1 %vm333_vm0, %v790_v10  ;;  %v782_v15 = vmul.f32 %v761_v12, %v670_v11  ;;  %v997_v33 = vpop.f32.mrf.mxu1 }
 0x13f   : > { %v671_v14 = vld [vmem:[#allocation2 + $0x78] sm:$0xff] }
 0x140   : > { %v783_v16 = vmul.f32 %v766_v13, %v671_v14 }
 0x142   : > { %v791_v17 = vpack.c.bf16 %v783_v16, %v782_v15 }
 0x144   : > { %1646 = vmatmul.mubr.msk.bf16.gmra.mxu1 %vm333_vm0, %v791_v17 }
 0x1d4   : > { %v1635_v34 = vpop.f32.mrf.mxu1 }
 0x1d5   : > { %v1100_v36 = vadd.f32 %v1635_v34, %v1611_v18 }
 0x1d6   : > { %v1091_v35 = vpop.f32.mrf.mxu1 }
 0x1d7   : > { %v1092_v38 = vadd.f32 %v1091_v35, %v946_v19  ;;  %v1156_v41 = vmax.f32 %v1100_v36, 0.0 }
 0x1d8   : > { %v1636_v37 = vpop.f32.mrf.mxu1 }
 0x1d9   : > { %v1103_v39 = vadd.f32 %v1636_v37, %v1612_v20  ;;  %v1154_v44 = vmax.f32 %v1092_v38, 0.0 }
 0x1da   : > { %v1094_v40 = vpop.f32.mrf.mxu1 }
 0x1db   : > { %v1157_v42 = vmax.f32 %v1103_v39, 0.0  ;;  %v1095_v43 = vadd.f32 %v1094_v40, %v949_v21 }
 0x1dd   : > { %v1474_v45 = vpack.c.bf16 %v1157_v42, %v1156_v41  ;;  %v1155_v46 = vmax.f32 %v1095_v43, 0.0 }
 0x1df   : > { %1506 = vst [vmem:[%s2091_s11 + $0x8] sm:$0xff] %v1474_v45   ;;  %v1469_v47 = vpack.c.bf16 %v1155_v46, %v1154_v44 }
 0x1e1   : > { %1470 = vst [vmem:[%s2091_s11] sm:$0xff] %v1469_v47  }
 0x1e4   : > { %v1639_v48 = vpop.f32.mrf.mxu1 }
 0x1e5   : > { %v1116_v50 = vadd.f32 %v1639_v48, %v1615_v22 }
 0x1e6   : > { %v1107_v49 = vpop.f32.mrf.mxu1 }
 0x1e7   : > { %v1108_v52 = vadd.f32 %v1107_v49, %v962_v23  ;;  %v1160_v55 = vmax.f32 %v1116_v50, 0.0 }
 0x1e8   : > { %v1640_v51 = vpop.f32.mrf.mxu1 }
 0x1e9   : > { %v1119_v53 = vadd.f32 %v1640_v51, %v1616_v24  ;;  %v1158_v58 = vmax.f32 %v1108_v52, 0.0 }
 0x1ea   : > { %v1110_v54 = vpop.f32.mrf.mxu1 }
 0x1eb   : > { %v1161_v56 = vmax.f32 %v1119_v53, 0.0  ;;  %v1111_v57 = vadd.f32 %v1110_v54, %v965_v25 }
 0x1ed   : > { %v1484_v59 = vpack.c.bf16 %v1161_v56, %v1160_v55  ;;  %v1159_v60 = vmax.f32 %v1111_v57, 0.0 }
 0x1ef   : > { %1508 = vst [vmem:[%s2091_s11 + $0x18] sm:$0xff] %v1484_v59   ;;  %v1479_v61 = vpack.c.bf16 %v1159_v60, %v1158_v58 }
 0x1f1   : > { %1507 = vst [vmem:[%s2091_s11 + $0x10] sm:$0xff] %v1479_v61  }
 0x1f4   : > { %v1643_v62 = vpop.f32.mrf.mxu1 }
 0x1f5   : > { %v1132_v0 = vadd.f32 %v1643_v62, %v1619_v26 }
 0x1f6   : > { %v1123_v63 = vpop.f32.mrf.mxu1 }
 0x1f7   : > { %v1124_v2 = vadd.f32 %v1123_v63, %v978_v27  ;;  %v1164_v5 = vmax.f32 %v1132_v0, 0.0 }
 0x1f8   : > { %v1644_v1 = vpop.f32.mrf.mxu1 }
 0x1f9   : > { %v1135_v3 = vadd.f32 %v1644_v1, %v1620_v28  ;;  %v1162_v8 = vmax.f32 %v1124_v2, 0.0 }
 0x1fa   : > { %v1126_v4 = vpop.f32.mrf.mxu1 }
 0x1fb   : > { %v1165_v6 = vmax.f32 %v1135_v3, 0.0  ;;  %v1127_v7 = vadd.f32 %v1126_v4, %v981_v29 }
 0x1fd   : > { %v1494_v9 = vpack.c.bf16 %v1165_v6, %v1164_v5  ;;  %v1163_v10 = vmax.f32 %v1127_v7, 0.0 }
 0x1ff   : > { %1510 = vst [vmem:[%s2091_s11 + $0x28] sm:$0xff] %v1494_v9   ;;  %v1489_v11 = vpack.c.bf16 %v1163_v10, %v1162_v8 }
 0x201   : > { %1509 = vst [vmem:[%s2091_s11 + $0x20] sm:$0xff] %v1489_v11  }
 0x204   : > { %v1647_v12 = vpop.f32.mrf.mxu1 }
 0x205   : > { %v1148_v14 = vadd.f32 %v1647_v12, %v1623_v30 }
 0x206   : > { %v1139_v13 = vpop.f32.mrf.mxu1 }
 0x207   : > { %v1140_v16 = vadd.f32 %v1139_v13, %v994_v31  ;;  %v1168_v19 = vmax.f32 %v1148_v14, 0.0 }
 0x208   : > { %v1648_v15 = vpop.f32.mrf.mxu1 }
 0x209   : > { %v1151_v17 = vadd.f32 %v1648_v15, %v1624_v32  ;;  %v1166_v22 = vmax.f32 %v1140_v16, 0.0 }
 0x20a   : > { %v1142_v18 = vpop.f32.mrf.mxu1 }
 0x20b   : > { %v1169_v20 = vmax.f32 %v1151_v17, 0.0  ;;  %v1143_v21 = vadd.f32 %v1142_v18, %v997_v33 }
 0x20d   : > { %v1504_v23 = vpack.c.bf16 %v1169_v20, %v1168_v19  ;;  %v1167_v24 = vmax.f32 %v1143_v21, 0.0 }
 0x20f   : > { %1512 = vst [vmem:[%s2091_s11 + $0x38] sm:$0xff] %v1504_v23   ;;  %v1499_v25 = vpack.c.bf16 %v1167_v24, %v1166_v22 }
 0x211   : > { %1511 = vst [vmem:[%s2091_s11 + $0x30] sm:$0xff] %v1499_v25  }
 0x212   : > { %1755 = shalt.err (!%p1752_p6)
}
 0x213   : > { %s1756_s19 = scalar_lea.hbm %s2104_s15, 1024  ;;  %s1760_s13 = scalar_lea.hbm %s2163_s6, 2048 }
 0x214   : > { %p1757_p7 = scmp.ne.s32.totalorder %s2104_s15, %s1756_s19  ;;  %p1761_p11 = scmp.lt.s32.totalorder %s2104_s15, %s2163_s6 }
 0x215   : > { %p1762_p12 = scmp.lt.s32.totalorder %s1760_s13, %s1756_s19 }
 0x216   : > { %p1758_p9 = pnand %p1757_p7, %p1900_p4 }
 0x217   : > { %p1763_p13 = por %p1762_p12, %p1761_p11 }
 0x218   : > { %p1759_p10 = pneg %p1758_p9 }
 0x21a   : > { %p1764_p0 = pnand %p1763_p13, %p1759_p10 }
 0x21c   : > { %1767 = shalt.err (!%p1764_p0)
}
 0x21d   : > { %s1823_s16 = smov 64   ;;  %s1824_s30 = smov 4  }
 0x21e   : > { %1649 = dma.vmem_to_hbm [thread:$0]  (%p1900_p4), %s2106_s27, 1024, %s2104_s15, %s2112_s14, %s1823_s16, %s1823_s16, %s1824_s30  }
 0x21f PF: > { %p1655_p1 = scmp.ge.s32.totalorder %s1818_s26, 2  ;;  %s1279_s24 = sand.u32 1, %s1798_s21  }
 0x220   : > { %s1280_s17 = scalar_lea.sflag [#allocation4], %s1279_s24 }
 0x221   : > { %p1652_p2 = pnand %p1655_p1, %p1907_p8 }
 0x223   : > { %p1653_p3 = pneg %p1652_p2 }
 0x225   : > { %1793 = dma.done.wait (%p1653_p3), %s1280_s17, 1024  }
 0x226   : > { %1795 = vsyncadd (%p1653_p3), %s1280_s17, 4294966272  ;;  %s19_s26 = sadd.s32 1, %s1818_s26   ;;  %s2166_s21 = smov %s1802_s22 }
 0x227   : > { %p16_p5 = scmp.ge.s32.totalorder %s19_s26, 4   ;;  %s2167_s22 = smov %s1806_s23 }
 0x228   : > { %s2168_s23 = smov %s1913_s10  ;;  %s2169_s24 = smov %s1814_s25 }
 0x229   : > { %s2170_s25 = smov %s2172_s29  ;;  %18 = sbr.rel (!%p16_p5) target bundleno = 4 (0x4), region = 94 }
 0x22e   :  { %1285 = vsyncpa [#allocation4], 1 }
 0x22f   :  { %1287 = vsyncpa [#allocation4 + $0x1], 1 }

</bundles_post_ra>
